<compile_context>
chip_gen: v6e
topology: v6e:2x2x1
jax: 0.10.0
libtpu: 0.0.40
codegen_flags: <defaults>
</compile_context>

<pallas_src>
import math

import jax
import jax.numpy as jnp
from jax.experimental import pallas as pl
from jax.experimental.pallas import tpu as pltpu


# ---------------------------------------------------------------------------
# Generation-aware VMEM budget.
# ---------------------------------------------------------------------------
def _vmem_budget_bytes():
  """Per-kernel VMEM budget: ~75% of physical VMEM, capped at 100 MiB.

  ~48 MiB on 64 MiB parts (v7x), ~96-100 MiB on 128 MiB parts (v5e/v6e).
  """
  cap = 64 * 1024 * 1024  # conservative default (v7x physical VMEM per TC)
  try:
    cap = pltpu.get_tpu_info().vmem_capacity_bytes
  except Exception:  # pragma: no cover - non-TPU tracing environments
    pass
  return min((cap * 3) // 4, 100 * 1024 * 1024)


def _tile_candidates(n, lane_aligned):
  """Divisor tile sizes for dim n (largest first); full extent always legal."""
  if lane_aligned:
    base = (1024, 512, 256, 128)            # last-dim blocks: multiples of 128
  else:
    base = (1024, 512, 256, 128, 64, 32, 16, 8)   # sublane dims: multiples of 8
  cands = {t for t in base if t <= n and n % t == 0}
  cands.add(n)                              # full extent is always legal
  return sorted(cands, reverse=True)


# ---------------------------------------------------------------------------
# Kernel 1 & 3: tiled lane-dense matmul (QKV projection / output projection).
# ---------------------------------------------------------------------------
def _matmul_kernel(a_ref, b_ref, o_ref, acc_ref):
  @pl.when(pl.program_id(2) == 0)
  def _init():
    acc_ref[...] = jnp.zeros_like(acc_ref)

  acc_ref[...] += jnp.dot(a_ref[...], b_ref[...],
                          preferred_element_type=jnp.float32)

  @pl.when(pl.program_id(2) == pl.num_programs(2) - 1)
  def _store():
    o_ref[...] = acc_ref[...].astype(o_ref.dtype)


def _matmul_vmem_bytes(tm, tk, tn, a_bytes, b_bytes, o_bytes):
  io = 2 * (tm * tk * a_bytes + tk * tn * b_bytes + tm * tn * o_bytes)  # 2 bufs
  return io + tm * tn * 4                                               # f32 acc


def _pick_matmul_tiles(M, K, N, budget, a_bytes, b_bytes, o_bytes):
  best_tiles, best_score = None, None
  for tm in _tile_candidates(M, lane_aligned=False):
    for tn in _tile_candidates(N, lane_aligned=True):
      for tk in _tile_candidates(K, lane_aligned=True):
        if _matmul_vmem_bytes(tm, tk, tn, a_bytes, b_bytes, o_bytes) > budget:
          continue
        score = (min(tm, tn), tm * tn, tk)   # prefer square-ish, large blocks
        if best_score is None or score > best_score:
          best_tiles, best_score = (tm, tk, tn), score
  assert best_tiles is not None, 'no matmul tiling fits the VMEM budget'
  return best_tiles


def _pallas_matmul(a, b, *, out_dtype, vmem_budget):
  """Tiled (M, K) @ (K, N) matmul, bf16 operands, f32 accumulation."""
  M, K = a.shape
  K2, N = b.shape
  assert K == K2
  tm, tk, tn = _pick_matmul_tiles(
      M, K, N, vmem_budget,
      a_bytes=a.dtype.itemsize, b_bytes=b.dtype.itemsize,
      o_bytes=jnp.dtype(out_dtype).itemsize)
  grid = (M // tm, N // tn, K // tk)
  return pl.pallas_call(
      _matmul_kernel,
      out_shape=jax.ShapeDtypeStruct((M, N), out_dtype),
      grid_spec=pltpu.PrefetchScalarGridSpec(
          num_scalar_prefetch=0,
          grid=grid,
          in_specs=[
              pl.BlockSpec((tm, tk), lambda i, j, k: (i, k)),
              pl.BlockSpec((tk, tn), lambda i, j, k: (k, j)),
          ],
          out_specs=pl.BlockSpec((tm, tn), lambda i, j, k: (i, j)),
          scratch_shapes=[pltpu.VMEM((tm, tn), jnp.float32)],
      ),
      compiler_params=pltpu.CompilerParams(
          dimension_semantics=('parallel', 'parallel', 'arbitrary'),
          vmem_limit_bytes=vmem_budget,
      ),
  )(a, b)


# ---------------------------------------------------------------------------
# Kernel 2: flash attention over pre-projected (B, H, L, D) tensors.
# ---------------------------------------------------------------------------
def _flash_attn_kernel(q_ref, k_ref, v_ref, o_ref, m_scr, l_scr, acc_scr):
  """One (batch, q_tile, kv_tile) grid step over all heads of one batch row."""
  ki = pl.program_id(2)

  @pl.when(ki == 0)
  def _init():
    m_scr[...] = jnp.full_like(m_scr, -jnp.inf)
    l_scr[...] = jnp.zeros_like(l_scr)
    acc_scr[...] = jnp.zeros_like(acc_scr)

  q = q_ref[0]  # (H, tq, D) bf16 -- 1/sqrt(D) already folded into W_q
  k = k_ref[0]  # (H, tk, D) bf16
  v = v_ref[0]  # (H, tk, D) bf16

  # Scores for all heads in one batched MXU call; f32 accumulation.
  s = jnp.einsum('hqd,hkd->hqk', q, k,
                 preferred_element_type=jnp.float32)            # (H, tq, tk)

  # Online softmax update (statistics stay f32; v5e VPU/EUP lack bf16).
  m_prev = m_scr[...]
  m_new = jnp.maximum(m_prev, jnp.max(s, axis=-1, keepdims=True))
  alpha = jnp.exp(m_prev - m_new)
  p = jnp.exp(s - m_new)                                        # (H, tq, tk)
  l_scr[...] = alpha * l_scr[...] + jnp.sum(p, axis=-1, keepdims=True)
  acc_scr[...] = alpha * acc_scr[...] + jnp.einsum(
      'hqk,hkd->hqd', p.astype(v.dtype), v,
      preferred_element_type=jnp.float32)                       # (H, tq, D)
  m_scr[...] = m_new

  @pl.when(ki == pl.num_programs(2) - 1)
  def _finalize():
    # Deferred normalization: one EUP reciprocal on (H, tq, 1).
    o_ref[0] = (acc_scr[...] *
                pl.reciprocal(l_scr[...], approx=True)).astype(o_ref.dtype)


def _attn_vmem_bytes(H, tq, tk, D, io_bytes=2):
  io = 2 * io_bytes * (2 * H * tq * D + 2 * H * tk * D)  # q/o + k/v, 2 bufs
  scores = 2 * H * tq * tk * 4                           # live f32 s and p
  stats = 2 * H * tq * 128 * 4                           # m,l pad to 128 lanes
  acc = H * tq * D * 4                                   # f32 accumulator
  return io + scores + stats + acc


def _pick_attn_tiles(B, H, L, S, D, budget):
  best_tiles, best_score = None, None
  for tq in _tile_candidates(L, lane_aligned=False):
    for tk in _tile_candidates(S, lane_aligned=False):
      if _attn_vmem_bytes(H, tq, tk, D) > budget:
        continue
      score = (tq * tk, tk)
      if best_score is None or score > best_score:
        best_tiles, best_score = (tq, tk), score
  assert best_tiles is not None, 'no attention tiling fits the VMEM budget'
  tq, tk = best_tiles
  # v7x has 2 TensorCores: keep the 'parallel' grid extent B*(L//tq) >= 2 so
  # both cores get work (only shrink when the result stays (8,·)-legal).
  while (B * (L // tq) < 2 and tq >= 16 and tq % 2 == 0
         and L % (tq // 2) == 0 and (tq // 2) % 8 == 0):
    tq //= 2
  return tq, tk


def _flash_attention(q, k, v, *, vmem_budget):
  B, H, L, D = q.shape
  S = k.shape[2]
  tq, tk = _pick_attn_tiles(B, H, L, S, D, vmem_budget)
  grid = (B, L // tq, S // tk)
  return pl.pallas_call(
      _flash_attn_kernel,
      out_shape=jax.ShapeDtypeStruct((B, H, L, D), q.dtype),
      grid_spec=pltpu.PrefetchScalarGridSpec(
          num_scalar_prefetch=0,
          grid=grid,
          in_specs=[
              pl.BlockSpec((1, H, tq, D), lambda b, qi, ki: (b, 0, qi, 0)),
              pl.BlockSpec((1, H, tk, D), lambda b, qi, ki: (b, 0, ki, 0)),
              pl.BlockSpec((1, H, tk, D), lambda b, qi, ki: (b, 0, ki, 0)),
          ],
          # Output tile is revisited across the kv (reduction) axis and
          # written once at the last kv step.
          out_specs=pl.BlockSpec((1, H, tq, D), lambda b, qi, ki: (b, 0, qi, 0)),
          scratch_shapes=[
              pltpu.VMEM((H, tq, 1), jnp.float32),   # running row max m
              pltpu.VMEM((H, tq, 1), jnp.float32),   # running denominator l
              pltpu.VMEM((H, tq, D), jnp.float32),   # un-normalized output acc
          ],
      ),
      compiler_params=pltpu.CompilerParams(
          dimension_semantics=('parallel', 'parallel', 'arbitrary'),
          vmem_limit_bytes=vmem_budget,
      ),
  )(q, k, v)


# ---------------------------------------------------------------------------
# Full forward pass.
# ---------------------------------------------------------------------------
def multihead_attention(x, w_in, w_out, *, num_heads):
  """Forward of the PyTorch MultiheadAttention module (self-attention path).

  Args:
    x:      (B, L, E) activations.
    w_in:   (3E, E) in_proj.weight  (PyTorch nn.Linear layout, y = x @ W.T).
    w_out:  (E, E)  out_proj.weight (PyTorch nn.Linear layout).
    num_heads: number of attention heads (E % num_heads == 0).
  Returns:
    (B, L, E) attention output, same dtype as x.
  """
  B, L, E = x.shape
  H = num_heads
  D = E // H
  assert D * H == E, 'embed_dim must be divisible by num_heads.'

  budget = _vmem_budget_bytes()
  scale = 1.0 / math.sqrt(D)

  # Fold the 1/sqrt(D) score scale into the query rows of in_proj: done once
  # in the wrapper (free XLA work), never per grid step.
  w_in_scaled = jnp.concatenate([w_in[:E] * scale, w_in[E:]], axis=0)

  # bf16 MXU operands (halves HBM<->VMEM DMA bytes); f32 accumulation in-kernel.
  x2d = x.reshape(B * L, E).astype(jnp.bfloat16)
  w_qkv = w_in_scaled.T.astype(jnp.bfloat16)   # (E, 3E): y = x @ W.T
  w_o = w_out.T.astype(jnp.bfloat16)           # (E, E)

  # 1) Fused QKV projection: computed exactly once, full MXU width.
  qkv = _pallas_matmul(x2d, w_qkv, out_dtype=jnp.bfloat16, vmem_budget=budget)

  # 2) Head split: wrapper-side layout plumbing (no in-kernel transposes or
  #    broadcast_to copies of the activation tile).
  q, k, v = jnp.split(qkv.reshape(B, L, 3 * E), 3, axis=-1)

  def heads(t):
    return t.reshape(B, L, H, D).transpose(0, 2, 1, 3)   # (B, H, L, D)

  # 3) Pure flash attention (no projection weights resident in VMEM).
  o = _flash_attention(heads(q), heads(k), heads(v), vmem_budget=budget)

  # 4) Merge heads and project: the head contraction happens inside one
  #    lane-dense (B*L, E) @ (E, E) matmul — no (H, tq, E) f32 intermediate.
  o2d = o.transpose(0, 2, 1, 3).reshape(B * L, E)
  out = _pallas_matmul(o2d, w_o, out_dtype=x.dtype, vmem_budget=budget)
  return out.reshape(B, L, E)


# ---------------------------------------------------------------------------
# Reference + test.
# ---------------------------------------------------------------------------
def _xavier_uniform(key, out_features, in_features):
  bound = math.sqrt(6.0 / (in_features + out_features))
  return jax.random.uniform(key, (out_features, in_features),
                            dtype=jnp.float32, minval=-bound, maxval=bound)


def _reference(x, w_in, w_out, num_heads):
  """Plain-JAX f32 reference mirroring the PyTorch forward (no mask/dropout)."""
  B, L, E = x.shape
  D = E // num_heads
  qkv = jnp.einsum('ble,fe->blf', x, w_in)        # (B, L, 3E)
  q, k, v = jnp.split(qkv, 3, axis=-1)
  q = q.reshape(B, L, num_heads, D).transpose(0, 2, 1, 3)
  k = k.reshape(B, L, num_heads, D).transpose(0, 2, 1, 3)
  v = v.reshape(B, L, num_heads, D).transpose(0, 2, 1, 3)
  s = jnp.einsum('bhqd,bhkd->bhqk', q, k) / math.sqrt(D)
  p = jax.nn.softmax(s, axis=-1)
  o = jnp.einsum('bhqk,bhkd->bhqd', p, v)
  o = o.transpose(0, 2, 1, 3).reshape(B, L, E)
  return jnp.einsum('ble,fe->blf', o, w_out)


if __name__ == '__main__':
  # Small shapes consistent with the module: batch=2, seq=8, embed=32, heads=4.
  B, L, E, H = 2, 8, 32, 4

  key = jax.random.PRNGKey(0)
  kx, kin, kout = jax.random.split(key, 3)

  x = jax.random.normal(kx, (B, L, E), dtype=jnp.float32)
  w_in = _xavier_uniform(kin, 3 * E, E)    # in_proj.weight  (3E, E)
  w_out = _xavier_uniform(kout, E, E)      # out_proj.weight (E, E)

  out = multihead_attention(x, w_in, w_out, num_heads=H)
  out = jax.block_until_ready(out)

  ref = _reference(x, w_in, w_out, H)
  assert out.shape == (B, L, E)
  # bf16 MXU operands (f32 accumulation) => looser tolerance vs the f32 ref.
  assert jnp.allclose(out, ref, atol=5e-2, rtol=5e-2), 'mismatch vs reference'

  print('KERNEL_OK')
</pallas_src>

<mosaic_0001>
module attributes {stable_mosaic.version = 11 : i64} {
  func.func @_matmul_kernel(%arg0: i32, %arg1: i32, %arg2: i32, %arg3: memref<16x32xbf16, #tpu.memory_space<vmem>>, %arg4: memref<32x96xbf16, #tpu.memory_space<vmem>>, %arg5: memref<16x96xbf16, #tpu.memory_space<vmem>>, %arg6: memref<16x96xf32, #tpu.memory_space<vmem>>) attributes {dimension_semantics = [#tpu.dimension_semantics<parallel>, #tpu.dimension_semantics<parallel>, #tpu.dimension_semantics<arbitrary>], iteration_bounds = array<i64: 1, 1, 1>, scalar_prefetch = 0 : i64, scratch_operands = 1 : i64, tpu.core_type = #tpu.core_type<tc>, window_params = [{transform_indices = @transform_0, window_bounds = array<i64: 16, 32>}, {transform_indices = @transform_1, window_bounds = array<i64: 32, 96>}, {transform_indices = @transform_2, window_bounds = array<i64: 16, 96>}]} {
    %c0_i32 = arith.constant 0 : i32
    %0 = arith.cmpi eq, %arg2, %c0_i32 : i32
    %1 = arith.extui %0 : i1 to i32
    %c0_i32_0 = arith.constant 0 : i32
    %2 = arith.cmpi ne, %1, %c0_i32_0 : i32
    scf.if %2 {
      %cst_10 = arith.constant 0.000000e+00 : f32
      %12 = vector.broadcast %cst_10 : f32 to vector<16x96xf32>
      %c0_11 = arith.constant 0 : index
      %c0_12 = arith.constant 0 : index
      %13 = vector.load %arg6[%c0_11, %c0_12] : memref<16x96xf32, #tpu.memory_space<vmem>>, vector<16x96xf32>
      tpu.vector_store %arg6[%c0_11, %c0_12], %12 {strides = array<i32>} : memref<16x96xf32, #tpu.memory_space<vmem>>, vector<16x96xf32>,
    } else {
    }
    %c0 = arith.constant 0 : index
    %c0_1 = arith.constant 0 : index
    %3 = vector.load %arg6[%c0, %c0_1] : memref<16x96xf32, #tpu.memory_space<vmem>>, vector<16x96xf32>
    %c0_2 = arith.constant 0 : index
    %c0_3 = arith.constant 0 : index
    %4 = vector.load %arg3[%c0_2, %c0_3] : memref<16x32xbf16, #tpu.memory_space<vmem>>, vector<16x32xbf16>
    %c0_4 = arith.constant 0 : index
    %c0_5 = arith.constant 0 : index
    %5 = vector.load %arg4[%c0_4, %c0_5] : memref<32x96xbf16, #tpu.memory_space<vmem>>, vector<32x96xbf16>
    %cst = arith.constant dense<0.000000e+00> : vector<16x96xf32>
    %6 = tpu.matmul %4, %5, %cst {dimension_numbers = #tpu.dot_dimension_numbers<[1], [0], [0], [1], [0, 0, 1, 1], [], []>} : vector<16x32xbf16>, vector<32x96xbf16>, vector<16x96xf32> -> vector<16x96xf32>
    %7 = arith.addf %3, %6 : vector<16x96xf32>
    %c0_6 = arith.constant 0 : index
    %c0_7 = arith.constant 0 : index
    %8 = vector.load %arg6[%c0_6, %c0_7] : memref<16x96xf32, #tpu.memory_space<vmem>>, vector<16x96xf32>
    tpu.vector_store %arg6[%c0_6, %c0_7], %7 {strides = array<i32>} : memref<16x96xf32, #tpu.memory_space<vmem>>, vector<16x96xf32>,
    %c0_i32_8 = arith.constant 0 : i32
    %9 = arith.cmpi eq, %arg2, %c0_i32_8 : i32
    %10 = arith.extui %9 : i1 to i32
    %c0_i32_9 = arith.constant 0 : i32
    %11 = arith.cmpi ne, %10, %c0_i32_9 : i32
    scf.if %11 {
      %c0_10 = arith.constant 0 : index
      %c0_11 = arith.constant 0 : index
      %12 = vector.load %arg6[%c0_10, %c0_11] : memref<16x96xf32, #tpu.memory_space<vmem>>, vector<16x96xf32>
      %13 = arith.truncf %12 : vector<16x96xf32> to vector<16x96xbf16>
      %c0_12 = arith.constant 0 : index
      %c0_13 = arith.constant 0 : index
      %14 = vector.load %arg5[%c0_12, %c0_13] : memref<16x96xbf16, #tpu.memory_space<vmem>>, vector<16x96xbf16>
      tpu.vector_store %arg5[%c0_12, %c0_13], %13 {strides = array<i32>} : memref<16x96xbf16, #tpu.memory_space<vmem>>, vector<16x96xbf16>,
    } else {
    }
    return
  }
  func.func @transform_0(%arg0: i32, %arg1: i32, %arg2: i32) -> (i32, i32) {
    %c0_i32 = arith.constant 0 : i32
    return %arg0, %arg2 : i32, i32
  }
  func.func @transform_1(%arg0: i32, %arg1: i32, %arg2: i32) -> (i32, i32) {
    %c0_i32 = arith.constant 0 : i32
    return %arg2, %arg1 : i32, i32
  }
  func.func @transform_2(%arg0: i32, %arg1: i32, %arg2: i32) -> (i32, i32) {
    %c0_i32 = arith.constant 0 : i32
    return %arg0, %arg1 : i32, i32
  }
}

</mosaic_0001>

<bundles_post_ra>
// kernel: tpu_custom_call.1
= control target key start
LH: loop header
LB: loop body
LE: loop exit
PB: predicated region body
PF: predicated region fallthrough
CT: control target
= control target key end

     0   :  { %7 = vsyncpa [#allocation4], 0  ;;  %s296_s0 = inlined_call_operand.hbm [shape: bf16[16,32], index: 0, kind: input, shape index: {}]   ;;  %s297_s1 = inlined_call_operand.hbm [shape: bf16[32,96], index: 1, kind: input, shape index: {}]   ;;  %s298_s2 = inlined_call_operand.hbm [shape: bf16[16,96], index: 2, kind: output, shape index: {}]  }
   0x1   :  { %8 = vsyncpa [#allocation7], 0 }
   0x2   :  { %9 = vsyncpa [#allocation5], 0  ;;  %s252_s9 = smov [#allocation3]  }
   0x3   :  { %s15_s10 = sshll.u32 %s252_s9, 4  ;;  %s16_s10 = int_to_ptr.vmem [resolvable:$true] %s15_s10 }
   0x4   :  { %s194_s11 = scalar_lea.vmem %s16_s10, 128  ;;  %p199_p1 = scmp.lt.s32.totalorder %s16_s10, %s16_s10 }
   0x5   :  { %p195_p0 = scmp.ne.s32.totalorder %s16_s10, %s194_s11  ;;  %p200_p2 = scmp.lt.s32.totalorder %s194_s11, %s194_s11 }
   0x7   :  { %p201_p3 = por %p200_p2, %p199_p1 }
   0x9   :  { %p202_p4 = pnand %p201_p3, %p195_p0 }
   0xb   :  { %205 = shalt.err (!%p202_p4)
}
   0xc   :  { %s253_s12 = smov 64   ;;  %s254_s13 = smov 4  }
   0xd   :  { %21 = dma.hbm_to_vmem [thread:$0]  %s296_s0, 128, %s16_s10, [#allocation4], %s253_s12, %s253_s12, %s254_s13  }
   0xe   :  { %s255_s16 = smov [#allocation6]  }
   0xf   :  { %s27_s17 = sshll.u32 %s255_s16, 4  ;;  %s28_s17 = int_to_ptr.vmem [resolvable:$true] %s27_s17 }
  0x10   :  { %s214_s18 = scalar_lea.vmem %s28_s17, 256  ;;  %p219_p6 = scmp.lt.s32.totalorder %s28_s17, %s28_s17 }
  0x11   :  { %p215_p5 = scmp.ne.s32.totalorder %s28_s17, %s214_s18  ;;  %p220_p7 = scmp.lt.s32.totalorder %s214_s18, %s214_s18 }
  0x13   :  { %p221_p8 = por %p220_p7, %p219_p6 }
  0x15   :  { %p222_p9 = pnand %p221_p8, %p215_p5 }
  0x17   :  { %225 = shalt.err (!%p222_p9)
}
  0x18   :  { %33 = dma.hbm_to_vmem [thread:$0]  %s297_s1, 256, %s28_s17, [#allocation7], %s253_s12, %s253_s12, %s254_s13  }
  0x19   :  { %246 = dma.done.wait [#allocation4], 128  }
  0x1a   :  { %247 = vsyncadd [#allocation4], 4294967168 }
  0x1b   :  { %248 = dma.done.wait [#allocation7], 256  }
  0x1c   :  { %249 = vsyncadd [#allocation7], 4294967040  ;;  %vm45_vm0 = vcmask 785408   ;;  %v256_v0 = vmov 0.0   ;;  %vm257_vm1 = vmmov 0   ;;  %v183_v1 = vld [vmem:[#allocation6 + $0x8] sm:$0xff]  }
  0x1d   :  { %46 = vst.msk [vmem:[#allocation2] sm:$0xff] %vm45_vm0, %v256_v0  ;;  %47 = vst.msk [vmem:[#allocation2 + $0x8] sm:$0xff] %vm45_vm0, %v256_v0  ;;  %168 = vmatprep.subr.bf16.mxu0 %v256_v0  ;;  %172 = vmatprep.mubr.msk.bf16.mxu0 %vm257_vm1, %v256_v0  ;;  %v184_v2 = vld [vmem:[#allocation6] sm:$0xff]   ;;  %v185_v3 = vld [vmem:[#allocation3] sm:$0xff]   ;;  %vm73_vm2 = vcmask 261120   ;;  %vm136_vm3 = vcmask 781312  }
  0x1e   :  { %169 = vmatpush3.bf16.msra.mxu0 %v183_v1  ;;  %s258_s0 = smov [#allocation8]  }
  0x1f   :  { %170 = vmatprep.subr.bf16.mxu0 %v256_v0  ;;  %s144_s1 = sshll.u32 %s258_s0, 4  ;;  %s145_s1 = int_to_ptr.vmem [resolvable:$true] %s144_s1 }
  0x20   :  { %s226_s21 = scalar_lea.vmem %s145_s1, 128  ;;  %p231_p11 = scmp.lt.s32.totalorder %s145_s1, %s145_s1 }
  0x21   :  { %p227_p10 = scmp.ne.s32.totalorder %s145_s1, %s226_s21  ;;  %p232_p12 = scmp.lt.s32.totalorder %s226_s21, %s226_s21 }
  0x22   :  { %171 = vmatpush3.bf16.msra.mxu0 %v184_v2 }
  0x23   :  { %p233_p13 = por %p232_p12, %p231_p11 }
  0x24   :  { %v48_v4 = vld [vmem:[#allocation2] sm:$0xff]  ;;  %v49_v8 = vld [vmem:[#allocation2 + $0x8] sm:$0xff] }
  0x25   :  { %173 = vmatmul.mubr.msk.bf16.vlgmr.msra.gmra.mxu0 %vm73_vm2, %v185_v3  ;;  %p234_p0 = pnand %p233_p13, %p227_p10 }
  0xe5   :  { %v111_v5 = vpop.f32.mrf.mxu0 }
  0xe6   :  { %v118_v6 = vadd.f32 %v111_v5, %v48_v4 }
  0xe7   :  { %v174_v7 = vpop.f32.mrf.mxu0 }
  0xe8   :  { %121 = vst.msk [vmem:[#allocation2] sm:$0xff] %vm45_vm0, %v118_v6 }
  0xe9   :  { %v114_v9 = vpop.f32.mrf.mxu0 }
  0xea   :  { %v119_v10 = vadd.f32 %v114_v9, %v49_v8 }
  0xeb   :  { %v175_v11 = vpop.f32.mrf.mxu0 }
  0xec   :  { %122 = vst.msk [vmem:[#allocation2 + $0x8] sm:$0xff] %vm45_vm0, %v119_v10 }
  0xef   :  { %v126_v12 = vld [vmem:[#allocation2] sm:$0xff] }
  0xf0   :  { %v163_v13 = vpack.c.bf16 %v126_v12, %v126_v12 }
  0xf2   :  { %137 = vst.msk [vmem:[#allocation8] sm:$0xf] %vm136_vm3, %v163_v13 }
  0xf3   :  { %v127_v14 = vld [vmem:[#allocation2 + $0x8] sm:$0xff] }
  0xf4   :  { %v164_v15 = vpack.c.bf16 %v127_v14, %v127_v14 }
  0xf6   :  { %138 = vst.msk [vmem:[#allocation8 + $0x4] sm:$0xf] %vm136_vm3, %v164_v15 }
  0xf7   :  { %237 = shalt.err (!%p234_p0)
}
  0xf8   :  { %150 = dma.vmem_to_hbm [thread:$0]  %s145_s1, 128, %s298_s2, [#allocation5], %s253_s12, %s253_s12, %s254_s13  }
  0xf9   :  { %250 = dma.done.wait [#allocation5], 128  }
  0xfa   :  { %251 = vsyncadd [#allocation5], 4294967168 }
  0xfb   :  { %154 = vsyncpa [#allocation4], 1 }
  0xfc   :  { %155 = vsyncpa [#allocation7], 1 }
  0xfd   :  { %156 = vsyncpa [#allocation5], 1 }

</bundles_post_ra>
